<compile_context>
chip_gen: v5e
topology: v5e:2x2
jax: 0.10.0
libtpu: 0.0.40
codegen_flags: <defaults>
</compile_context>

<pallas_src>
import jax
import jax.numpy as jnp
from jax.experimental import pallas as pl
from jax.experimental.pallas import tpu as pltpu


# ---------------------------------------------------------------------------
# Path A (default for materialize=True): whole-array HBM -> HBM DMA copy.
# ---------------------------------------------------------------------------
def _dma_copy_kernel(x_hbm, o_hbm, sem):
    cp = pltpu.make_async_copy(x_hbm, o_hbm, sem)
    cp.start()
    cp.wait()


def _dma_copy_pallas(x: jax.Array) -> jax.Array:
    """Fresh copy of `x` via a single HBM->HBM DMA (no VMEM round trip)."""
    return pl.pallas_call(
        _dma_copy_kernel,
        out_shape=jax.ShapeDtypeStruct(x.shape, x.dtype),
        in_specs=[pl.BlockSpec(memory_space=pl.ANY)],
        out_specs=pl.BlockSpec(memory_space=pl.ANY),
        scratch_shapes=[pltpu.SemaphoreType.DMA],
    )(x)


# ---------------------------------------------------------------------------
# Path B (alternative): lane-dense tiled VMEM copy, generation-aware tiling.
# ---------------------------------------------------------------------------
def _copy_kernel(x_ref, o_ref):
    o_ref[...] = x_ref[...]


def _tpu_generation_params():
    """Returns (block_bytes, vmem_capacity_bytes_or_None, is_v7x)."""
    vmem_cap = None
    kind = ""
    try:
        info = pltpu.get_tpu_info()
        vmem_cap = getattr(info, "vmem_capacity_bytes", None)
    except Exception:
        pass
    try:
        kind = jax.devices()[0].device_kind.lower()
    except Exception:
        pass
    is_v7x = ("v7" in kind) or (vmem_cap is not None and vmem_cap <= (64 << 20))
    # v5e/v6e: 2 MiB blocks already hit ~85%+ of HBM roofline and stay inside
    # the 16/32 MiB default scoped-VMEM limit (4 x block = 8 MiB).
    # v7x: HBM is ~3.2 TB/s, so a 2 MiB step is ~2.5 us and the ~0.35 us
    # per-step overhead is 13-25%; use ~6 MiB blocks (4 x block = 24 MiB).
    block_bytes = (6 << 20) if is_v7x else (2 << 20)
    return block_bytes, vmem_cap, is_v7x


def _tiled_copy_pallas(x: jax.Array) -> jax.Array:
    """Fresh copy of `x` via a tiled, lane-dense BlockSpec-pipelined kernel."""
    total = x.size
    if total == 0:
        return jnp.copy(x)

    lanes = None
    for cand in (1024, 512, 256, 128):
        if total % cand == 0:
            lanes = cand
            break
    if lanes is None:
        # Lane-ragged (e.g. an (R, 5) ROI tensor): an XLA copy still honors
        # the fresh-buffer contract without masked partial-store overhead.
        return jnp.copy(x)

    rows = total // lanes
    itemsize = jnp.dtype(x.dtype).itemsize
    block_bytes, vmem_cap, is_v7x = _tpu_generation_params()
    max_rows = max(8, block_bytes // (lanes * itemsize))

    if rows <= max_rows:
        block_rows = rows  # single block; full-extent dims are always legal
    else:
        # Largest multiple of 8 <= max_rows.  The trailing block may be
        # partial (masked) — one masked step beats degrading to 8-row blocks.
        block_rows = max(8, max_rows - (max_rows % 8))

    # On v7x, make sure the "parallel" row axis has >= 2 blocks so both
    # TensorCores get work (no effect on v5e/v6e).
    if is_v7x and rows > 8 and pl.cdiv(rows, block_rows) == 1:
        half = (rows + 1) // 2
        block_rows = max(8, half + (-half % 8))

    grid = (pl.cdiv(rows, block_rows),)

    # Size the scoped VMEM to actual need (in + out, double buffered) plus
    # slack, capped at ~75% of physical VMEM when known.
    block_bytes_actual = block_rows * lanes * itemsize
    vmem_limit = max(8 << 20, 4 * block_bytes_actual + (2 << 20))
    if vmem_cap is not None:
        vmem_limit = min(vmem_limit, (vmem_cap * 3) // 4)

    # NOTE: reshape is a free bitcast only for contiguous inputs; transposed /
    # sliced inputs would pay an extra XLA materialization before the kernel.
    flat = x.reshape(rows, lanes)

    out = pl.pallas_call(
        _copy_kernel,
        out_shape=jax.ShapeDtypeStruct((rows, lanes), x.dtype),
        grid=grid,
        in_specs=[pl.BlockSpec((block_rows, lanes), lambda i: (i, 0))],
        out_specs=pl.BlockSpec((block_rows, lanes), lambda i: (i, 0)),
        compiler_params=pltpu.CompilerParams(
            dimension_semantics=("parallel",),
            vmem_limit_bytes=int(vmem_limit),
        ),
    )(flat)
    return out.reshape(x.shape)


# ---------------------------------------------------------------------------
# Dispatcher + module-equivalent wrapper.
# ---------------------------------------------------------------------------
_SMALL_BYPASS_BYTES = 1 << 20  # below this, kernel launch cost dwarfs the copy


def _materialize_copy(x: jax.Array, *, use_dma: bool = True,
                      force_pallas: bool = False) -> jax.Array:
    if x.size == 0:
        return jnp.copy(x)
    nbytes = x.size * jnp.dtype(x.dtype).itemsize
    if not force_pallas and nbytes < _SMALL_BYPASS_BYTES:
        # Tiny tensors (the (R,5) ROI boxes, small feature maps): XLA copy is
        # cheaper than any kernel dispatch and still returns a fresh buffer.
        return jnp.copy(x)
    if use_dma:
        return _dma_copy_pallas(x)
    return _tiled_copy_pallas(x)


def roi_transform_layer(*inputs, materialize: bool = False,
                        use_dma: bool = True, force_pallas: bool = False):
    """Pallas port of RoiTransformLayer.forward: returns inputs unchanged.

    Default path is an exact pass-through (zero HBM traffic, buffer identity),
    matching the PyTorch semantics.  materialize=True returns fresh buffers
    (HBM->HBM DMA by default, tiled VMEM copy with use_dma=False, XLA copy for
    tiny tensors).
    """
    # TODO(synk): the PyTorch forward has no compute at all; everything beyond
    # the pass-through exists only to offer an optional fresh-buffer copy.
    if not materialize:
        return tuple(inputs)
    return tuple(
        _materialize_copy(x, use_dma=use_dma, force_pallas=force_pallas)
        for x in inputs
    )


if __name__ == "__main__":
    key = jax.random.PRNGKey(0)
    k1, k2 = jax.random.split(key)

    # Small shapes consistent with a typical ROI-transform call site:
    # a feature map (NCHW) and ROIs (batch_idx, x1, y1, x2, y2).
    feats = jax.random.normal(k1, (2, 4, 16, 16), dtype=jnp.float32)
    rois = jax.random.uniform(k2, (8, 5), dtype=jnp.float32) * 16.0

    # 1) Default pass-through: identical objects, zero cost.
    out = roi_transform_layer(feats, rois)
    assert isinstance(out, tuple) and len(out) == 2
    assert out[0] is feats and out[1] is rois

    # 2) materialize=True: fresh buffers (these small tensors take the
    #    jnp.copy bypass; the fresh-buffer contract now holds for rois too).
    out_copy = jax.block_until_ready(
        roi_transform_layer(feats, rois, materialize=True))
    assert out_copy[0].shape == feats.shape and out_copy[0].dtype == feats.dtype
    assert out_copy[1].shape == rois.shape and out_copy[1].dtype == rois.dtype
    assert jnp.array_equal(out_copy[0], feats)
    assert jnp.array_equal(out_copy[1], rois)

    # 3) Exercise both Pallas kernels once on the lane-friendly tensor.
    feats_dma = jax.block_until_ready(_dma_copy_pallas(feats))
    assert jnp.array_equal(feats_dma, feats)
    feats_tiled = jax.block_until_ready(_tiled_copy_pallas(feats))
    assert jnp.array_equal(feats_tiled, feats)

    print("KERNEL_OK")
</pallas_src>

<mosaic_0001>
module attributes {stable_mosaic.version = 11 : i64} {
  func.func @_dma_copy_kernel(%arg0: memref<2x4x16x16xf32, #tpu.memory_space<any>>, %arg1: memref<2x4x16x16xf32, #tpu.memory_space<any>>, %arg2: memref<!tpu.dma_semaphore, #tpu.memory_space<semaphore_mem>>) attributes {dimension_semantics = [], scalar_prefetch = 0 : i64, scratch_operands = 1 : i64, tpu.core_type = #tpu.core_type<tc>} {
    tpu.enqueue_dma source(%arg0 : memref<2x4x16x16xf32, #tpu.memory_space<any>>) target(%arg1 : memref<2x4x16x16xf32, #tpu.memory_space<any>>) target_semaphore(%arg2 : memref<!tpu.dma_semaphore, #tpu.memory_space<semaphore_mem>>)
    tpu.wait_dma2 semaphore(%arg2 : memref<!tpu.dma_semaphore, #tpu.memory_space<semaphore_mem>>) src(%arg0 : memref<2x4x16x16xf32, #tpu.memory_space<any>>) dst(%arg1 : memref<2x4x16x16xf32, #tpu.memory_space<any>>)
    return
  }
}

</mosaic_0001>

<bundles_post_ra>
// kernel: tpu_custom_call.1
= control target key start
LH: loop header
LB: loop body
LE: loop exit
PB: predicated region body
PF: predicated region fallthrough
CT: control target
= control target key end

     0   :  { %s34_s12 = smov [#allocation2]   ;;  %s35_s13 = smov [#allocation3]   ;;  %s53_s0 = inlined_call_operand.hbm [shape: f32[2,4,16,16], index: 0, kind: input, shape index: {}]   ;;  %s54_s1 = inlined_call_operand.hbm [shape: f32[2,4,16,16], index: 1, kind: output, shape index: {}]  }
   0x1   :  { %s10_s8 = sshll.u32 %s53_s0, 4  ;;  %s12_s11 = sshll.u32 %s54_s1, 4  ;;  %s11_s8 = int_to_ptr.hbm [resolvable:$true] %s10_s8  ;;  %s13_s11 = int_to_ptr.hbm [resolvable:$true] %s12_s11 }
   0x2   :  { %s36_s14 = smov 0  }
   0x3   :  { %16 = dma.general %s11_s8, 2048, %s13_s11, %s34_s12, %s35_s13, [#allocation4], %s36_s14, 0  }
   0x4   :  { %32 = dma.done.wait [#allocation2], 2048 }
   0x5   :  { %33 = vsyncadd [#allocation2], 4294965248 }
   0x6   :  { %22 = vsyncmov [#allocation2] }
   0x9   :  { %s23_s15 = vpop.sfrf %22 }
   0xa   :  { %p28_p0 = scmp.ne.s32.totalorder %s23_s15, 0 }
   0xc   :  { %27 = shalt.err (%p28_p0)  }

</bundles_post_ra>
